<compile_context>
chip_gen: v7x
topology: tpu7x:2x2x1
jax: 0.10.0
libtpu: 0.0.40
codegen_flags: <defaults>
</compile_context>

<pallas_src>
import jax
import jax.numpy as jnp
from jax.experimental import pallas as pl
from jax.experimental.pallas import tpu as pltpu

_LANE = 128


def _round_up(v, m):
    return ((v + m - 1) // m) * m


def _dropout_kernel(scale_ref, x_ref, o_ref):
    # scale_ref: (TILE_B, 1) per-sample folded scale, already in x's dtype.
    # x_ref / o_ref: (TILE_B, TILE_F) slab of activations (lane-dense).
    # One broadcast-multiply per vreg; the kernel is pure HBM streaming.
    o_ref[...] = x_ref[...] * scale_ref[...]


def _pick_block_budget():
    """Generation-aware (block_bytes, vmem_limit_bytes) chosen at trace time."""
    try:
        vmem_capacity = pltpu.get_tpu_info().vmem_capacity_bytes
    except Exception:  # unknown chip / interpret mode -> conservative default
        vmem_capacity = 128 << 20
    if vmem_capacity <= (64 << 20):
        # v7x-class: fast HBM, 64 MiB VMEM. 8 MiB blocks double-buffered
        # (in + out) = 32 MiB hits the scoped default, so raise the limit.
        return 8 << 20, 48 << 20
    # v5e / v6e: 2 MiB blocks are already ~85% of HBM roofline and stay well
    # inside v5e's 16 MiB default scoped VMEM. No limit override needed.
    return 2 << 20, None


def custom_dropout(x, key, probability, *, allow_identity_fast_path=False):
    """Pallas implementation of CustomDropout.forward.

    x:   (B, ...) float activation (NCHW in the molecule transformer).
    key: jax PRNG key standing in for torch.rand's global RNG.
    """
    # NOTE: probability == 1.0 gives keep_prob == 0 and inf/NaN scale -- this
    # matches the PyTorch reference exactly, so no guard is added.
    keep_prob = 1.0 - probability
    orig_shape = x.shape
    B = int(x.shape[0])
    F = 1
    for d in x.shape[1:]:
        F *= int(d)

    if allow_identity_fast_path:
        # floor(U[0,1)) == 0 => folded scale == 1.0 exactly, so x * scale is
        # bitwise x; skip the whole 2x-HBM pass when the caller allows it.
        return x

    # torch.rand((B,1,...), dtype=x.dtype); floor(U[0,1)) == 0 always.
    u = jax.random.uniform(key, (B,) + (1,) * (x.ndim - 1), dtype=x.dtype)
    scale = ((keep_prob + jnp.floor(u)) / keep_prob).reshape(B, 1).astype(x.dtype)

    xf = x.reshape(B, F)                  # free view: no pad, no extra HBM pass
    itemsize = x.dtype.itemsize
    sublane = max(8, 32 // itemsize)      # 8 f32, 16 bf16, 32 int8/fp8

    target_block_bytes, vmem_limit_bytes = _pick_block_budget()

    # --- feature (lane) tiling: TILE_F multiple of 128, or == F if F < 128 ---
    if F <= _LANE:
        tile_f = F
    else:
        max_f = max(_LANE, (target_block_bytes // itemsize) // _LANE * _LANE)
        tile_f = min(_round_up(F, _LANE), max_f)

    # --- batch (sublane) tiling: pack samples until the block hits target ----
    rows_fit = max(1, target_block_bytes // (tile_f * itemsize))
    if rows_fit >= B or B <= sublane:
        tile_b = B                                    # block dim == full dim
    else:
        tile_b = max(sublane, (min(rows_fit, B) // sublane) * sublane)

    grid_b = pl.cdiv(B, tile_b)
    grid_f = pl.cdiv(F, tile_f)

    # --- megacore floor: keep >= 2 grid steps so both v7x TCs stream ---------
    if grid_b * grid_f < 2:
        if tile_f > _LANE:
            tile_f = _round_up(pl.cdiv(tile_f, 2), _LANE)
            grid_f = pl.cdiv(F, tile_f)
        elif tile_b > sublane:
            tile_b = max(sublane, _round_up(pl.cdiv(tile_b, 2), sublane))
            grid_b = pl.cdiv(B, tile_b)
        # else: the whole tensor is one tiny tile; nothing worth splitting.

    x_spec = pl.BlockSpec((tile_b, tile_f), lambda i, j: (i, j))
    scale_spec = pl.BlockSpec((tile_b, 1), lambda i, j: (i, 0))

    cp_kwargs = dict(dimension_semantics=("parallel", "parallel"))
    if vmem_limit_bytes is not None:
        cp_kwargs["vmem_limit_bytes"] = vmem_limit_bytes

    out = pl.pallas_call(
        _dropout_kernel,
        out_shape=jax.ShapeDtypeStruct((B, F), x.dtype),
        grid_spec=pltpu.PrefetchScalarGridSpec(
            num_scalar_prefetch=0,
            grid=(grid_b, grid_f),
            in_specs=[scale_spec, x_spec],
            out_specs=x_spec,
        ),
        compiler_params=pltpu.CompilerParams(**cp_kwargs),
        cost_estimate=pl.CostEstimate(
            flops=int(x.size),
            transcendentals=0,
            bytes_accessed=2 * int(x.size) * itemsize,
        ),
    )(scale, xf)

    return out.reshape(orig_shape)


def _reference(x, key, probability):
    keep_prob = 1.0 - probability
    u = jax.random.uniform(key, (x.shape[0],) + (1,) * (x.ndim - 1), dtype=x.dtype)
    random_tensor = keep_prob + jnp.floor(u)
    return (x / keep_prob) * random_tensor


if __name__ == "__main__":
    probability = 0.1
    key = jax.random.PRNGKey(0)
    kx, kmask, kx2 = jax.random.split(key, 3)

    # Small NCHW activation consistent with the module's usage.
    x = jax.random.normal(kx, (2, 4, 16, 16), dtype=jnp.float32)
    out = jax.block_until_ready(custom_dropout(x, kmask, probability))
    ref = _reference(x, kmask, probability)
    assert out.shape == x.shape and out.dtype == x.dtype
    # Folded per-sample scale is exactly 1.0; reference's (x/keep_prob)*keep_prob
    # may differ by one ulp -> small tolerances.
    assert jnp.allclose(out, ref, atol=1e-6, rtol=1e-6)

    # Non-128-aligned feature count exercises the pad-free ragged-block path.
    x2 = jax.random.normal(kx2, (2, 3, 10, 10), dtype=jnp.float32)
    out2 = jax.block_until_ready(custom_dropout(x2, kmask, probability))
    ref2 = _reference(x2, kmask, probability)
    assert out2.shape == x2.shape and out2.dtype == x2.dtype
    assert jnp.allclose(out2, ref2, atol=1e-6, rtol=1e-6)

    print("KERNEL_OK")
</pallas_src>

<mosaic_0001>
module attributes {stable_mosaic.version = 11 : i64} {
  func.func @_dropout_kernel(%arg0: i32, %arg1: i32, %arg2: memref<2x1xf32, #tpu.memory_space<vmem>>, %arg3: memref<2x512xf32, #tpu.memory_space<vmem>>, %arg4: memref<2x512xf32, #tpu.memory_space<vmem>>) attributes {dimension_semantics = [#tpu.dimension_semantics<parallel>, #tpu.dimension_semantics<parallel>], iteration_bounds = array<i64: 1, 2>, scalar_prefetch = 0 : i64, scratch_operands = 0 : i64, tpu.core_type = #tpu.core_type<tc>, window_params = [{transform_indices = @transform_0, window_bounds = array<i64: 2, 1>}, {transform_indices = @transform_1, window_bounds = array<i64: 2, 512>}, {transform_indices = @transform_2, window_bounds = array<i64: 2, 512>}]} {
    %c0 = arith.constant 0 : index
    %c0_0 = arith.constant 0 : index
    %0 = vector.load %arg3[%c0, %c0_0] : memref<2x512xf32, #tpu.memory_space<vmem>>, vector<2x512xf32>
    %c0_1 = arith.constant 0 : index
    %c0_2 = arith.constant 0 : index
    %1 = vector.load %arg2[%c0_1, %c0_2] : memref<2x1xf32, #tpu.memory_space<vmem>>, vector<2x1xf32>
    %2 = vector.broadcast %1 : vector<2x1xf32> to vector<2x512xf32>
    %3 = arith.mulf %0, %2 : vector<2x512xf32>
    %c0_3 = arith.constant 0 : index
    %c0_4 = arith.constant 0 : index
    %4 = vector.load %arg4[%c0_3, %c0_4] : memref<2x512xf32, #tpu.memory_space<vmem>>, vector<2x512xf32>
    tpu.vector_store %arg4[%c0_3, %c0_4], %3 {strides = array<i32>} : memref<2x512xf32, #tpu.memory_space<vmem>>, vector<2x512xf32>,
    return
  }
  func.func @transform_0(%arg0: i32, %arg1: i32) -> (i32, i32) {
    %c0_i32 = arith.constant 0 : i32
    %c0_i32_0 = arith.constant 0 : i32
    return %arg0, %c0_i32 : i32, i32
  }
  func.func @transform_1(%arg0: i32, %arg1: i32) -> (i32, i32) {
    %c0_i32 = arith.constant 0 : i32
    return %arg0, %arg1 : i32, i32
  }
  func.func @transform_2(%arg0: i32, %arg1: i32) -> (i32, i32) {
    %c0_i32 = arith.constant 0 : i32
    return %arg0, %arg1 : i32, i32
  }
}

</mosaic_0001>

<bundles_post_ra>
// kernel: tpu_custom_call.1
= control target key start
LH: loop header
LB: loop body
LE: loop exit
PB: predicated region body
PF: predicated region fallthrough
CT: control target
= control target key end

     0   :  { %7 = vsyncpa [#allocation3], 0  ;;  %s720_s0 = inlined_call_operand.vmem [shape: f32[2,1], index: 0, kind: input, shape index: {}]   ;;  %s721_s1 = inlined_call_operand.hbm [shape: f32[2,1024], index: 1, kind: input, shape index: {}]   ;;  %s722_s2 = inlined_call_operand.hbm [shape: f32[2,1024], index: 2, kind: output, shape index: {}]  }
   0x1   :  { %9 = vsyncpa [#allocation3 + $0x1], 0 }
   0x2   :  { %10 = vsyncpa [#allocation4], 0 }
   0x3   :  { %12 = vsyncpa [#allocation4 + $0x1], 0  ;;  %s545_s9 = smov 0   ;;  %s547_s10 = smov 0  }
   0x4   :  { %s549_s11 = smov 0   ;;  %s551_s12 = smov 0  }
   0x5   :  { %s553_s13 = smov 0   ;;  %s555_s14 = smov 0  }
   0x6 LB: > { %s329_s15 = sadd.s32 4294967295, %s524_s14   ;;  %s330_s16 = sadd.s32 4294967294, %s524_s14   ;;  %s524_s14 = sphi %s555_s14, %s18_s14   ;;  %s520_s13 = sphi %s553_s13, %s738_s13   ;;  %s516_s12 = sphi %s551_s12, %s737_s12   ;;  %s512_s11 = sphi %s549_s11, %s736_s11   ;;  %s508_s10 = sphi %s547_s10, %s735_s10   ;;  %s504_s9 = sphi %s545_s9, %s734_s9  }
   0x7   : > { %s27_s17 = sadd.s32 1, %s520_s13  ;;  %s65_s18 = sadd.s32 1, %s512_s11 }
   0x8   : > { %p28_p0 = scmp.ge.s32.totalorder %s27_s17, 2  ;;  %p72_p1 = scmp.ne.s32.totalorder %s512_s11, %s508_s10 }
   0x9   : > { %p73_p2 = scmp.eq.s32.totalorder %s524_s14, 0  ;;  %p78_p3 = scmp.ne.s32.totalorder %s508_s10, %s504_s9 }
   0xa   : > { %s740_s17 = smov (%p28_p0, %s27_s17), 0  ;;  %p79_p5 = scmp.eq.s32.totalorder %s329_s15, 0 }
   0xb   : > { %p586_p4 = por %p73_p2, %p72_p1  ;;  %s61_s20 = ssub.s32 %s520_s13, %s740_s17 }
   0xc   : > { %p104_p6 = scmp.eq.s32.totalorder %s329_s15, 1  ;;  %p63_p7 = scmp.eq.s32.totalorder %s61_s20, 0 }
   0xd   : > { %p592_p8 = por %p79_p5, %p78_p3  ;;  %p110_p10 = scmp.eq.s32.totalorder %s330_s16, 1 }
   0xe   : > { %p596_p9 = por %p104_p6, %p72_p1  ;;  %p359_p13 = scmp.lt.s32.totalorder %s524_s14, 2 }
   0xf   : > { %s601_s23 = scalar_select %p63_p7, %s512_s11, %s65_s18  }
  0x10   : > { %s726_s22 = scalar_select %p596_p9, 1, 0 }
  0x11   : > { %p603_p11 = por %p110_p10, %p78_p3  ;;  %s137_s25 = sand.u32 1, %s512_s11  }
  0x12   : > { %s334_s26 = sshll.u32 %s137_s25, 3  ;;  %s345_s27 = sshll.u32 %s520_s13, 7 }
  0x13   : > { %s727_s24 = scalar_select %p603_p11, 1, 0 }
  0x14   : > { %s614_s30 = scalar_lea.hbm %s721_s1, %s345_s27  ;;  %s141_s3 = scalar_lea.vmem [#allocation2], %s334_s26 }
  0x15   : > { %s151_s4 = sshll.u32 %s141_s3, 4  ;;  %p620_p0 = pnand %p359_p13, %p586_p4  ;;  %s616_s4 = int_to_ptr.vmem [resolvable:$true] %s151_s4 }
  0x16   : > { %s138_s6 = scalar_lea.sflag [#allocation3], %s137_s25  ;;  %s412_s7 = scalar_lea.hbm %s614_s30, 128 }
  0x17   : > { %p413_p3 = scmp.ne.s32.totalorder %s614_s30, %s412_s7  ;;  %p414_p5 = pneg %p620_p0 }
  0x18   : > { %s417_s16 = scalar_lea.hbm %s721_s1, 256  ;;  %p418_p4 = scmp.lt.u32.totalorder %s614_s30, %s721_s1 }
  0x19   : > { %p415_p6 = pnand %p414_p5, %p413_p3  ;;  %p419_p10 = scmp.lt.u32.totalorder %s417_s16, %s412_s7 }
  0x1a   : > { %p421_p12 = scmp.lt.u32.totalorder %s412_s7, %s614_s30 }
  0x1b   : > { %p416_p7 = pneg %p415_p6  ;;  %p420_p13 = por %p419_p10, %p418_p4 }
  0x1d   : > { %p422_p1 = por %p421_p12, %p420_p13 }
  0x1f   : > { %p423_p2 = pnand %p422_p1, %p416_p7 }
  0x21   : > { %426 = shalt.err (!%p423_p2)
}
  0x22   : > { %s427_s20 = scalar_lea.vmem %s616_s4, 128  ;;  %s526_s25 = smov [#allocation2]  }
  0x23   : > { %p428_p3 = scmp.ne.s32.totalorder %s616_s4, %s427_s20  ;;  %s432_s26 = sshll.u32 %s526_s25, 4  ;;  %s433_s26 = int_to_ptr.vmem [resolvable:$false] %s432_s26 }
  0x24   : > { %s434_s27 = scalar_lea.vmem %s433_s26, 256  ;;  %p435_p9 = scmp.lt.s32.totalorder %s616_s4, %s433_s26 }
  0x25   : > { %p430_p6 = pnand %p428_p3, %p414_p5  ;;  %p436_p4 = scmp.lt.s32.totalorder %s434_s27, %s427_s20 }
  0x27   : > { %p431_p11 = pneg %p430_p6  ;;  %p437_p10 = por %p436_p4, %p435_p9 }
  0x29   : > { %p438_p12 = pnand %p437_p10, %p431_p11 }
  0x2b   : > { %441 = shalt.err (!%p438_p12)
}
  0x2c   : > { %354 = dma.hbm_to_vmem [thread:$0]  (!%p620_p0), %s614_s30, 128, %s616_s4, %s138_s6  }
  0x2d   : > { %p729_p1 = scmp.lt.s32.totalorder %s524_s14, 3  ;;  %p730_p2 = scmp.ge.s32.totalorder %s524_s14, 1 }
  0x2f   : > { %p157_p5 = pnand %p730_p2, %p729_p1 }
  0x30   : > { %s656_s28 = sand.u32 (!%p157_p5), 1, %s508_s10  }
  0x31   : > { %160 = sbr.rel (%p157_p5) target bundleno = 205 (0xcd), region = 28  ;;  %s338_s29 = sshll.u32 (!%p157_p5), %s656_s28, 3 }
  0x32   : > { %s163_s3 = scalar_lea.sflag (!%p157_p5), [#allocation3], %s656_s28  ;;  %s166_s7 = scalar_lea.vmem (!%p157_p5), [#allocation2], %s338_s29 }
  0x38   : > { %495 = dma.done.wait (%p592_p8), %s163_s3, 128  }
  0x39   : > { %497 = vsyncadd (%p592_p8), %s163_s3, 4294967168  ;;  %v527_v0 = vmov 0   ;;  %v198_v1 = vld [vmem:[%s720_s0] sm:$0x3]  ;;  %v528_v2 = vmov 269488144   ;;  %v206_v4 = vlaneseq }
  0x3a   : > { %411 = vset.pattern.permute.xlu0 %v527_v0  ;;  %v204_v3 = vunpack.c.l.s4 %v528_v2  ;;  %v197_v9 = vld [vmem:[%s166_s7] sm:$0xff]  ;;  %s346_s21 = sshll.u32 %s516_s12, 7  ;;  %s190_s5 = scalar_lea.vmem [#allocation5], %s338_s29 }
  0x3b   : > { %201 = vperm.xlu0 %411, %v198_v1   ;;  %v207_v6 = vshrl.u32 %v206_v4, 7  ;;  %s230_s6 = sshll.u32 %s190_s5, 4  ;;  %s671_s16 = scalar_lea.hbm %s722_s2, %s346_s21  ;;  %s673_s6 = int_to_ptr.vmem [resolvable:$true] %s230_s6 }
  0x3c   : > { %v205_v5 = vunpack.c.0.s8 %v204_v3  ;;  %s214_s18 = scalar_lea.sflag [#allocation4], %s656_s28  ;;  %s442_s19 = scalar_lea.vmem %s673_s6, 128 }
  0x3d   : > { %p443_p8 = scmp.ne.s32.totalorder %s673_s6, %s442_s19  ;;  %p731_p9 = scmp.ne.s32.totalorder %s726_s22, 0 }
  0x3e   : > { %v208_v7 = vsub.s32 %v205_v5, %v207_v6  ;;  %s529_s12 = smov [#allocation5]  }
  0x3f   : > { %p444_p11 = pnand %p443_p8, %p731_p9  ;;  %s446_s20 = sshll.u32 %s529_s12, 4  ;;  %s447_s20 = int_to_ptr.vmem [resolvable:$false] %s446_s20 }
  0x40   : > { %s448_s25 = scalar_lea.vmem %s447_s20, 256  ;;  %p449_p7 = scmp.lt.s32.totalorder %s673_s6, %s447_s20 }
  0x41   : > { %p445_p0 = pneg %p444_p11  ;;  %p450_p13 = scmp.lt.s32.totalorder %s448_s25, %s442_s19 }
  0x43   : > { %p451_p3 = por %p450_p13, %p449_p7 }
  0x45   : > { %p452_p6 = pnand %p451_p3, %p445_p0 }
  0xba   : > { %v202_v8 = vpop.permute.xlu0 %201 }
  0xbb   : > { %v209_v10 = vrot.slane %v202_v8, %v208_v7 }
  0xbd   : > { %v211_v11 = vmul.f32 %v209_v10, %v197_v9 }
  0xbf   : > { %212 = vst [vmem:[%s190_s5] sm:$0xff] %v211_v11 }
  0xc0   : > { %455 = shalt.err (!%p452_p6)
}
  0xc1   : > { %s456_s26 = scalar_lea.hbm %s671_s16, 128  ;;  %s460_s29 = scalar_lea.hbm %s722_s2, 256 }
  0xc2   : > { %p457_p4 = scmp.ne.s32.totalorder %s671_s16, %s456_s26  ;;  %p461_p1 = scmp.lt.u32.totalorder %s671_s16, %s722_s2 }
  0xc3   : > { %p462_p2 = scmp.lt.u32.totalorder %s460_s29, %s456_s26  ;;  %p464_p8 = scmp.lt.u32.totalorder %s456_s26, %s671_s16 }
  0xc4   : > { %p458_p10 = pnand %p457_p4, %p731_p9 }
  0xc5   : > { %p463_p5 = por %p462_p2, %p461_p1 }
  0xc6   : > { %p459_p12 = pneg %p458_p10 }
  0xc7   : > { %p465_p11 = por %p464_p8, %p463_p5 }
  0xc9   : > { %p466_p0 = pnand %p465_p11, %p459_p12 }
  0xcb   : > { %469 = shalt.err (!%p466_p0)
}
  0xcc   : > { %349 = dma.vmem_to_hbm [thread:$0]  (%p731_p9), %s673_s6, 128, %s671_s16, %s214_s18  }
  0xcd PF: > { %s242_s30 = sand.u32 1, %s504_s9   ;;  %p732_p7 = scmp.ne.s32.totalorder %s727_s24, 0 }
  0xce   : > { %p733_p13 = scmp.ge.s32.totalorder %s524_s14, 2  ;;  %s243_s4 = scalar_lea.sflag [#allocation4], %s242_s30 }
  0xd0   : > { %p356_p3 = pnand %p733_p13, %p732_p7 }
  0xd2   : > { %499 = dma.done.wait (!%p356_p3), %s243_s4, 128  }
  0xd3   : > { %501 = vsyncadd (!%p356_p3), %s243_s4, 4294967168  ;;  %s18_s14 = sadd.s32 1, %s524_s14   ;;  %s734_s9 = smov %s508_s10 }
  0xd4   : > { %p15_p6 = scmp.ge.s32.totalorder %s18_s14, 4   ;;  %s735_s10 = smov %s512_s11 }
  0xd5   : > { %s736_s11 = smov %s601_s23  ;;  %s737_s12 = smov %s520_s13 }
  0xd6   : > { %s738_s13 = smov %s740_s17  ;;  %17 = sbr.rel (!%p15_p6) target bundleno = 6 (0x6), region = 76 }
  0xdd   :  { %248 = vsyncpa [#allocation3], 1 }
  0xde   :  { %250 = vsyncpa [#allocation3 + $0x1], 1 }
  0xdf   :  { %251 = vsyncpa [#allocation4], 1 }
  0xe0   :  { %253 = vsyncpa [#allocation4 + $0x1], 1 }

</bundles_post_ra>
